<compile_context>
chip_gen: v5e
topology: v5e:2x2
jax: 0.10.0
libtpu: 0.0.40
codegen_flags: <defaults>
</compile_context>

<pallas_src>
import jax
import jax.numpy as jnp
from jax import lax
from jax.experimental import pallas as pl
from jax.experimental.pallas import tpu as pltpu

_C1 = 0.01 ** 2
_C2 = 0.03 ** 2


def _shift(a, axis, delta):
    """Array whose element at index i along `axis` is a[i + delta] (|delta|=1).

    Border positions (where i + delta is out of range) hold wrapped-around
    data; the caller replaces them with the reflected tap via a select, so the
    wrap contents never reach the output.  Uses an XLU roll when the block's
    last two dims are (8, 128)-aligned, otherwise a slice+concatenate shift.
    """
    size = a.shape[axis]
    if a.shape[-2] % 8 == 0 and a.shape[-1] % 128 == 0:
        return pltpu.roll(a, (-delta) % size, axis)
    if delta == 1:
        parts = [lax.slice_in_dim(a, 1, size, axis=axis),
                 lax.slice_in_dim(a, 0, 1, axis=axis)]
    else:  # delta == -1
        parts = [lax.slice_in_dim(a, size - 1, size, axis=axis),
                 lax.slice_in_dim(a, 0, size - 1, axis=axis)]
    return jnp.concatenate(parts, axis=axis)


def _ssim_kernel(x_ref, y_ref, out_ref):
    # x_ref / y_ref / out_ref: (cb, H, W) blocks in the native dtype.
    x = x_ref[...].astype(jnp.float32)
    y = y_ref[...].astype(jnp.float32)
    cb, h, w = x.shape

    # Border masks, built once and shared by all five box filters (keeps the
    # broadcasts hoisted out of the unrolled box3 calls).
    col = lax.broadcasted_iota(jnp.int32, (cb, h, w), 2)
    row = lax.broadcasted_iota(jnp.int32, (cb, h, w), 1)
    first_c, last_c = col == 0, col == w - 1
    first_r, last_r = row == 0, row == h - 1

    def box3(a):
        # 3x3 average pool of the ReflectionPad2d(1)-padded `a`, as a
        # separable box filter.  Neighbour taps come from _shift (XLU rolls on
        # aligned blocks); the reflected tap at the image border is restored
        # with a select (pad row -1 == row 1, pad row H == row H-2, etc.).
        left, right = _shift(a, 2, -1), _shift(a, 2, +1)
        hsum = a + jnp.where(first_c, right, left) + jnp.where(last_c, left, right)
        up, down = _shift(hsum, 1, -1), _shift(hsum, 1, +1)
        vsum = hsum + jnp.where(first_r, down, up) + jnp.where(last_r, up, down)
        return vsum * (1.0 / 9.0)

    mu_x = box3(x)
    mu_y = box3(y)
    ex2 = box3(x * x)
    ey2 = box3(y * y)
    exy = box3(x * y)

    # Hoisted products, reused by both sigma_* and SSIM_n / SSIM_d.
    mu_xx = mu_x * mu_x
    mu_yy = mu_y * mu_y
    mu_xy = mu_x * mu_y

    sigma_x = ex2 - mu_xx
    sigma_y = ey2 - mu_yy
    sigma_xy = exy - mu_xy

    ssim_n = (2.0 * mu_xy + _C1) * (2.0 * sigma_xy + _C2)
    ssim_d = (mu_xx + mu_yy + _C1) * (sigma_x + sigma_y + _C2)

    # EUP approximate reciprocal + one Newton refinement (rel. err ~1e-8)
    # instead of a full VALU divide; ssim_d >= C1*C2 > 0 so it is safe.
    inv_d = pl.reciprocal(ssim_d, approx=True)
    inv_d = inv_d * (2.0 - ssim_d * inv_d)

    out = jnp.clip((1.0 - ssim_n * inv_d) * 0.5, 0.0, 1.0)
    out_ref[...] = out.astype(out_ref.dtype)


def _largest_divisor_leq(n, cap):
    cap = int(max(1, min(n, cap)))
    for d in range(cap, 0, -1):
        if n % d == 0:
            return d
    return 1


def ssim_loss(x, y):
    """x, y: (B, C, H, W). Returns the per-pixel SSIM loss map (B, C, H, W)."""
    assert x.shape == y.shape, "inconsistent shapes"
    B, C, H, W = x.shape
    assert H >= 2 and W >= 2, "ReflectionPad2d(1) needs H, W >= 2"
    BC = B * C

    # Free (metadata-only) reshapes; no HBM-side padding at all.
    xr = x.reshape(BC, H, W)
    yr = y.reshape(BC, H, W)

    # --- channel-slab sizing ------------------------------------------------
    # ~10 live f32 temporaries of (cb, H, W) dominate VMEM, plus 2 inputs x 2
    # pipeline buffers and 2 output buffers in the native dtype.  Keep the f32
    # slab at <= 512 KiB so the total stays well under v5e's 16 MiB default
    # scoped VMEM and far below v7x's 64 MiB physical VMEM.
    f32_slab_bytes = H * W * 4
    cb_vmem = max(1, (512 * 1024) // f32_slab_bytes)
    # Keep >= min(BC, 4) grid steps so the "parallel" axis can shard across
    # both TensorCores on v7x and the DMA pipeline stays fed.
    cb_parallel = max(1, BC // min(BC, 4))
    # Divisor of BC: no remainder padding, no out[:BC] slice.
    cb = _largest_divisor_leq(BC, min(cb_vmem, cb_parallel))

    spec = pl.BlockSpec((cb, H, W), lambda i: (i, 0, 0))
    out = pl.pallas_call(
        _ssim_kernel,
        out_shape=jax.ShapeDtypeStruct((BC, H, W), x.dtype),
        grid_spec=pltpu.PrefetchScalarGridSpec(
            num_scalar_prefetch=0,
            grid=(BC // cb,),
            in_specs=[spec, spec],
            out_specs=spec,
        ),
        compiler_params=pltpu.CompilerParams(
            dimension_semantics=("parallel",),
            vmem_limit_bytes=32 * 1024 * 1024,  # headroom; usage is ~10 MiB max
        ),
    )(xr, yr)

    return out.reshape(B, C, H, W)


def _ssim_ref(x, y):
    """Pure-JAX reference mirroring the PyTorch module."""
    pad_cfg = ((0, 0), (0, 0), (1, 1), (1, 1))
    xp = jnp.pad(x.astype(jnp.float32), pad_cfg, mode="reflect")
    yp = jnp.pad(y.astype(jnp.float32), pad_cfg, mode="reflect")

    def avgpool3(a):
        s = lax.reduce_window(a, 0.0, lax.add, (1, 1, 3, 3), (1, 1, 1, 1), "VALID")
        return s / 9.0

    mu_x = avgpool3(xp)
    mu_y = avgpool3(yp)
    sigma_x = avgpool3(xp * xp) - mu_x ** 2
    sigma_y = avgpool3(yp * yp) - mu_y ** 2
    sigma_xy = avgpool3(xp * yp) - mu_x * mu_y
    n = (2 * mu_x * mu_y + _C1) * (2 * sigma_xy + _C2)
    d = (mu_x ** 2 + mu_y ** 2 + _C1) * (sigma_x + sigma_y + _C2)
    return jnp.clip((1 - n / d) / 2, 0.0, 1.0)


if __name__ == "__main__":
    key = jax.random.PRNGKey(0)
    k1, k2 = jax.random.split(key)

    # W = 128 keeps the lane axis dense (full-width unmasked stores) and
    # exercises the XLU-roll fast path; unaligned widths are still handled by
    # the slice+concatenate fallback in _shift.
    B, C, H, W = 2, 4, 16, 128
    x = jax.random.uniform(k1, (B, C, H, W), dtype=jnp.float32)
    y = jax.random.uniform(k2, (B, C, H, W), dtype=jnp.float32)

    loss_map = jax.block_until_ready(ssim_loss(x, y))
    ref = _ssim_ref(x, y)

    assert loss_map.shape == (B, C, H, W), loss_map.shape
    assert jnp.allclose(loss_map, ref.astype(loss_map.dtype), rtol=1e-4, atol=1e-5), (
        float(jnp.max(jnp.abs(loss_map.astype(jnp.float32) - ref)))
    )
    print("KERNEL_OK")
</pallas_src>

<mosaic_0001>
module attributes {stable_mosaic.version = 11 : i64} {
  func.func @_ssim_kernel(%arg0: i32, %arg1: memref<2x16x128xf32, #tpu.memory_space<vmem>>, %arg2: memref<2x16x128xf32, #tpu.memory_space<vmem>>, %arg3: memref<2x16x128xf32, #tpu.memory_space<vmem>>) attributes {dimension_semantics = [#tpu.dimension_semantics<parallel>], iteration_bounds = array<i64: 4>, scalar_prefetch = 0 : i64, scratch_operands = 0 : i64, tpu.core_type = #tpu.core_type<tc>, window_params = [{transform_indices = @transform_0, window_bounds = array<i64: 2, 16, 128>}, {transform_indices = @transform_1, window_bounds = array<i64: 2, 16, 128>}, {transform_indices = @transform_2, window_bounds = array<i64: 2, 16, 128>}]} {
    %c0 = arith.constant 0 : index
    %c0_0 = arith.constant 0 : index
    %c0_1 = arith.constant 0 : index
    %0 = vector.load %arg1[%c0, %c0_0, %c0_1] : memref<2x16x128xf32, #tpu.memory_space<vmem>>, vector<2x16x128xf32>
    %c0_2 = arith.constant 0 : index
    %c0_3 = arith.constant 0 : index
    %c0_4 = arith.constant 0 : index
    %1 = vector.load %arg2[%c0_2, %c0_3, %c0_4] : memref<2x16x128xf32, #tpu.memory_space<vmem>>, vector<2x16x128xf32>
    %2 = tpu.iota {dimensions = array<i32: 2>} : vector<2x16x128xi32>
    %3 = tpu.iota {dimensions = array<i32: 1>} : vector<2x16x128xi32>
    %c0_i32 = arith.constant 0 : i32
    %4 = vector.broadcast %c0_i32 : i32 to vector<2x16x128xi32>
    %5 = arith.cmpi eq, %2, %4 : vector<2x16x128xi32>
    %c127_i32 = arith.constant 127 : i32
    %6 = vector.broadcast %c127_i32 : i32 to vector<2x16x128xi32>
    %7 = arith.cmpi eq, %2, %6 : vector<2x16x128xi32>
    %c0_i32_5 = arith.constant 0 : i32
    %8 = vector.broadcast %c0_i32_5 : i32 to vector<2x16x128xi32>
    %9 = arith.cmpi eq, %3, %8 : vector<2x16x128xi32>
    %c15_i32 = arith.constant 15 : i32
    %10 = vector.broadcast %c15_i32 : i32 to vector<2x16x128xi32>
    %11 = arith.cmpi eq, %3, %10 : vector<2x16x128xi32>
    %c1_i32 = arith.constant 1 : i32
    %12 = tpu.dynamic_rotate %0 by %c1_i32 dim 2 : vector<2x16x128xf32>, i32 -> vector<2x16x128xf32>
    %c127_i32_6 = arith.constant 127 : i32
    %13 = tpu.dynamic_rotate %0 by %c127_i32_6 dim 2 : vector<2x16x128xf32>, i32 -> vector<2x16x128xf32>
    %14 = arith.select %5, %13, %12 : vector<2x16x128xi1>, vector<2x16x128xf32>
    %15 = arith.addf %0, %14 : vector<2x16x128xf32>
    %16 = arith.select %7, %12, %13 : vector<2x16x128xi1>, vector<2x16x128xf32>
    %17 = arith.addf %15, %16 : vector<2x16x128xf32>
    %c1_i32_7 = arith.constant 1 : i32
    %18 = tpu.dynamic_rotate %17 by %c1_i32_7 dim 1 : vector<2x16x128xf32>, i32 -> vector<2x16x128xf32>
    %c15_i32_8 = arith.constant 15 : i32
    %19 = tpu.dynamic_rotate %17 by %c15_i32_8 dim 1 : vector<2x16x128xf32>, i32 -> vector<2x16x128xf32>
    %20 = arith.select %9, %19, %18 : vector<2x16x128xi1>, vector<2x16x128xf32>
    %21 = arith.addf %17, %20 : vector<2x16x128xf32>
    %22 = arith.select %11, %18, %19 : vector<2x16x128xi1>, vector<2x16x128xf32>
    %23 = arith.addf %21, %22 : vector<2x16x128xf32>
    %cst = arith.constant 0.111111112 : f32
    %24 = vector.broadcast %cst : f32 to vector<2x16x128xf32>
    %25 = arith.mulf %23, %24 : vector<2x16x128xf32>
    %c1_i32_9 = arith.constant 1 : i32
    %26 = tpu.dynamic_rotate %1 by %c1_i32_9 dim 2 : vector<2x16x128xf32>, i32 -> vector<2x16x128xf32>
    %c127_i32_10 = arith.constant 127 : i32
    %27 = tpu.dynamic_rotate %1 by %c127_i32_10 dim 2 : vector<2x16x128xf32>, i32 -> vector<2x16x128xf32>
    %28 = arith.select %5, %27, %26 : vector<2x16x128xi1>, vector<2x16x128xf32>
    %29 = arith.addf %1, %28 : vector<2x16x128xf32>
    %30 = arith.select %7, %26, %27 : vector<2x16x128xi1>, vector<2x16x128xf32>
    %31 = arith.addf %29, %30 : vector<2x16x128xf32>
    %c1_i32_11 = arith.constant 1 : i32
    %32 = tpu.dynamic_rotate %31 by %c1_i32_11 dim 1 : vector<2x16x128xf32>, i32 -> vector<2x16x128xf32>
    %c15_i32_12 = arith.constant 15 : i32
    %33 = tpu.dynamic_rotate %31 by %c15_i32_12 dim 1 : vector<2x16x128xf32>, i32 -> vector<2x16x128xf32>
    %34 = arith.select %9, %33, %32 : vector<2x16x128xi1>, vector<2x16x128xf32>
    %35 = arith.addf %31, %34 : vector<2x16x128xf32>
    %36 = arith.select %11, %32, %33 : vector<2x16x128xi1>, vector<2x16x128xf32>
    %37 = arith.addf %35, %36 : vector<2x16x128xf32>
    %cst_13 = arith.constant 0.111111112 : f32
    %38 = vector.broadcast %cst_13 : f32 to vector<2x16x128xf32>
    %39 = arith.mulf %37, %38 : vector<2x16x128xf32>
    %40 = arith.mulf %0, %0 : vector<2x16x128xf32>
    %c1_i32_14 = arith.constant 1 : i32
    %41 = tpu.dynamic_rotate %40 by %c1_i32_14 dim 2 : vector<2x16x128xf32>, i32 -> vector<2x16x128xf32>
    %c127_i32_15 = arith.constant 127 : i32
    %42 = tpu.dynamic_rotate %40 by %c127_i32_15 dim 2 : vector<2x16x128xf32>, i32 -> vector<2x16x128xf32>
    %43 = arith.select %5, %42, %41 : vector<2x16x128xi1>, vector<2x16x128xf32>
    %44 = arith.addf %40, %43 : vector<2x16x128xf32>
    %45 = arith.select %7, %41, %42 : vector<2x16x128xi1>, vector<2x16x128xf32>
    %46 = arith.addf %44, %45 : vector<2x16x128xf32>
    %c1_i32_16 = arith.constant 1 : i32
    %47 = tpu.dynamic_rotate %46 by %c1_i32_16 dim 1 : vector<2x16x128xf32>, i32 -> vector<2x16x128xf32>
    %c15_i32_17 = arith.constant 15 : i32
    %48 = tpu.dynamic_rotate %46 by %c15_i32_17 dim 1 : vector<2x16x128xf32>, i32 -> vector<2x16x128xf32>
    %49 = arith.select %9, %48, %47 : vector<2x16x128xi1>, vector<2x16x128xf32>
    %50 = arith.addf %46, %49 : vector<2x16x128xf32>
    %51 = arith.select %11, %47, %48 : vector<2x16x128xi1>, vector<2x16x128xf32>
    %52 = arith.addf %50, %51 : vector<2x16x128xf32>
    %cst_18 = arith.constant 0.111111112 : f32
    %53 = vector.broadcast %cst_18 : f32 to vector<2x16x128xf32>
    %54 = arith.mulf %52, %53 : vector<2x16x128xf32>
    %55 = arith.mulf %1, %1 : vector<2x16x128xf32>
    %c1_i32_19 = arith.constant 1 : i32
    %56 = tpu.dynamic_rotate %55 by %c1_i32_19 dim 2 : vector<2x16x128xf32>, i32 -> vector<2x16x128xf32>
    %c127_i32_20 = arith.constant 127 : i32
    %57 = tpu.dynamic_rotate %55 by %c127_i32_20 dim 2 : vector<2x16x128xf32>, i32 -> vector<2x16x128xf32>
    %58 = arith.select %5, %57, %56 : vector<2x16x128xi1>, vector<2x16x128xf32>
    %59 = arith.addf %55, %58 : vector<2x16x128xf32>
    %60 = arith.select %7, %56, %57 : vector<2x16x128xi1>, vector<2x16x128xf32>
    %61 = arith.addf %59, %60 : vector<2x16x128xf32>
    %c1_i32_21 = arith.constant 1 : i32
    %62 = tpu.dynamic_rotate %61 by %c1_i32_21 dim 1 : vector<2x16x128xf32>, i32 -> vector<2x16x128xf32>
    %c15_i32_22 = arith.constant 15 : i32
    %63 = tpu.dynamic_rotate %61 by %c15_i32_22 dim 1 : vector<2x16x128xf32>, i32 -> vector<2x16x128xf32>
    %64 = arith.select %9, %63, %62 : vector<2x16x128xi1>, vector<2x16x128xf32>
    %65 = arith.addf %61, %64 : vector<2x16x128xf32>
    %66 = arith.select %11, %62, %63 : vector<2x16x128xi1>, vector<2x16x128xf32>
    %67 = arith.addf %65, %66 : vector<2x16x128xf32>
    %cst_23 = arith.constant 0.111111112 : f32
    %68 = vector.broadcast %cst_23 : f32 to vector<2x16x128xf32>
    %69 = arith.mulf %67, %68 : vector<2x16x128xf32>
    %70 = arith.mulf %0, %1 : vector<2x16x128xf32>
    %c1_i32_24 = arith.constant 1 : i32
    %71 = tpu.dynamic_rotate %70 by %c1_i32_24 dim 2 : vector<2x16x128xf32>, i32 -> vector<2x16x128xf32>
    %c127_i32_25 = arith.constant 127 : i32
    %72 = tpu.dynamic_rotate %70 by %c127_i32_25 dim 2 : vector<2x16x128xf32>, i32 -> vector<2x16x128xf32>
    %73 = arith.select %5, %72, %71 : vector<2x16x128xi1>, vector<2x16x128xf32>
    %74 = arith.addf %70, %73 : vector<2x16x128xf32>
    %75 = arith.select %7, %71, %72 : vector<2x16x128xi1>, vector<2x16x128xf32>
    %76 = arith.addf %74, %75 : vector<2x16x128xf32>
    %c1_i32_26 = arith.constant 1 : i32
    %77 = tpu.dynamic_rotate %76 by %c1_i32_26 dim 1 : vector<2x16x128xf32>, i32 -> vector<2x16x128xf32>
    %c15_i32_27 = arith.constant 15 : i32
    %78 = tpu.dynamic_rotate %76 by %c15_i32_27 dim 1 : vector<2x16x128xf32>, i32 -> vector<2x16x128xf32>
    %79 = arith.select %9, %78, %77 : vector<2x16x128xi1>, vector<2x16x128xf32>
    %80 = arith.addf %76, %79 : vector<2x16x128xf32>
    %81 = arith.select %11, %77, %78 : vector<2x16x128xi1>, vector<2x16x128xf32>
    %82 = arith.addf %80, %81 : vector<2x16x128xf32>
    %cst_28 = arith.constant 0.111111112 : f32
    %83 = vector.broadcast %cst_28 : f32 to vector<2x16x128xf32>
    %84 = arith.mulf %82, %83 : vector<2x16x128xf32>
    %85 = arith.mulf %25, %25 : vector<2x16x128xf32>
    %86 = arith.mulf %39, %39 : vector<2x16x128xf32>
    %87 = arith.mulf %25, %39 : vector<2x16x128xf32>
    %88 = arith.subf %54, %85 : vector<2x16x128xf32>
    %89 = arith.subf %69, %86 : vector<2x16x128xf32>
    %90 = arith.subf %84, %87 : vector<2x16x128xf32>
    %cst_29 = arith.constant 2.000000e+00 : f32
    %91 = vector.broadcast %cst_29 : f32 to vector<2x16x128xf32>
    %92 = arith.mulf %91, %87 : vector<2x16x128xf32>
    %cst_30 = arith.constant 9.99999974E-5 : f32
    %93 = vector.broadcast %cst_30 : f32 to vector<2x16x128xf32>
    %94 = arith.addf %92, %93 : vector<2x16x128xf32>
    %cst_31 = arith.constant 2.000000e+00 : f32
    %95 = vector.broadcast %cst_31 : f32 to vector<2x16x128xf32>
    %96 = arith.mulf %95, %90 : vector<2x16x128xf32>
    %cst_32 = arith.constant 8.99999984E-4 : f32
    %97 = vector.broadcast %cst_32 : f32 to vector<2x16x128xf32>
    %98 = arith.addf %96, %97 : vector<2x16x128xf32>
    %99 = arith.mulf %94, %98 : vector<2x16x128xf32>
    %100 = arith.addf %85, %86 : vector<2x16x128xf32>
    %cst_33 = arith.constant 9.99999974E-5 : f32
    %101 = vector.broadcast %cst_33 : f32 to vector<2x16x128xf32>
    %102 = arith.addf %100, %101 : vector<2x16x128xf32>
    %103 = arith.addf %88, %89 : vector<2x16x128xf32>
    %cst_34 = arith.constant 8.99999984E-4 : f32
    %104 = vector.broadcast %cst_34 : f32 to vector<2x16x128xf32>
    %105 = arith.addf %103, %104 : vector<2x16x128xf32>
    %106 = arith.mulf %102, %105 : vector<2x16x128xf32>
    %107 = tpu.reciprocal %106 {approx = true} : vector<2x16x128xf32> -> vector<2x16x128xf32>
    %108 = arith.mulf %106, %107 : vector<2x16x128xf32>
    %cst_35 = arith.constant 2.000000e+00 : f32
    %109 = vector.broadcast %cst_35 : f32 to vector<2x16x128xf32>
    %110 = arith.subf %109, %108 : vector<2x16x128xf32>
    %111 = arith.mulf %107, %110 : vector<2x16x128xf32>
    %112 = arith.mulf %99, %111 : vector<2x16x128xf32>
    %cst_36 = arith.constant 1.000000e+00 : f32
    %113 = vector.broadcast %cst_36 : f32 to vector<2x16x128xf32>
    %114 = arith.subf %113, %112 : vector<2x16x128xf32>
    %cst_37 = arith.constant 5.000000e-01 : f32
    %115 = vector.broadcast %cst_37 : f32 to vector<2x16x128xf32>
    %116 = arith.mulf %114, %115 : vector<2x16x128xf32>
    %cst_38 = arith.constant 0.000000e+00 : f32
    %cst_39 = arith.constant 1.000000e+00 : f32
    %117 = vector.broadcast %cst_38 : f32 to vector<2x16x128xf32>
    %118 = arith.maximumf %117, %116 : vector<2x16x128xf32>
    %119 = vector.broadcast %cst_39 : f32 to vector<2x16x128xf32>
    %120 = arith.minimumf %119, %118 : vector<2x16x128xf32>
    %c0_40 = arith.constant 0 : index
    %c0_41 = arith.constant 0 : index
    %c0_42 = arith.constant 0 : index
    %121 = vector.load %arg3[%c0_40, %c0_41, %c0_42] : memref<2x16x128xf32, #tpu.memory_space<vmem>>, vector<2x16x128xf32>
    tpu.vector_store %arg3[%c0_40, %c0_41, %c0_42], %120 {strides = array<i32>} : memref<2x16x128xf32, #tpu.memory_space<vmem>>, vector<2x16x128xf32>,
    return
  }
  func.func @transform_0(%arg0: i32) -> (i32, i32, i32) {
    %c0_i32 = arith.constant 0 : i32
    %c0_i32_0 = arith.constant 0 : i32
    %c0_i32_1 = arith.constant 0 : i32
    return %arg0, %c0_i32, %c0_i32_0 : i32, i32, i32
  }
  func.func @transform_1(%arg0: i32) -> (i32, i32, i32) {
    %c0_i32 = arith.constant 0 : i32
    %c0_i32_0 = arith.constant 0 : i32
    %c0_i32_1 = arith.constant 0 : i32
    return %arg0, %c0_i32, %c0_i32_0 : i32, i32, i32
  }
  func.func @transform_2(%arg0: i32) -> (i32, i32, i32) {
    %c0_i32 = arith.constant 0 : i32
    %c0_i32_0 = arith.constant 0 : i32
    %c0_i32_1 = arith.constant 0 : i32
    return %arg0, %c0_i32, %c0_i32_0 : i32, i32, i32
  }
}

</mosaic_0001>

<bundles_post_ra>
// kernel: tpu_custom_call.1
= control target key start
LH: loop header
LB: loop body
LE: loop exit
PB: predicated region body
PF: predicated region fallthrough
CT: control target
= control target key end

     0   :  { %7 = vsyncpa [#allocation3], 0  ;;  %s1682_s0 = inlined_call_operand.hbm [shape: f32[8,16,128], index: 0, kind: input, shape index: {}]   ;;  %s1683_s1 = inlined_call_operand.hbm [shape: f32[8,16,128], index: 1, kind: input, shape index: {}]   ;;  %s1684_s2 = inlined_call_operand.hbm [shape: f32[8,16,128], index: 2, kind: output, shape index: {}]  }
   0x1   :  { %9 = vsyncpa [#allocation3 + $0x1], 0 }
   0x2   :  { %10 = vsyncpa [#allocation6], 0 }
   0x3   :  { %12 = vsyncpa [#allocation6 + $0x1], 0 }
   0x4   :  { %13 = vsyncpa [#allocation4], 0 }
   0x5   :  { %15 = vsyncpa [#allocation4 + $0x1], 0  ;;  %s1046_s9 = smov 0   ;;  %s1048_s10 = smov 0  }
   0x6   :  { %s1050_s11 = smov 0   ;;  %s1052_s12 = smov 0  }
   0x7 LB: > { %s1067_s13 = sadd.s32 4294967295, %s1023_s12   ;;  %s801_s14 = sadd.s32 4294967294, %s1023_s12   ;;  %s1023_s12 = sphi %s1052_s12, %s1694_s12   ;;  %s1019_s11 = sphi %s1050_s11, %s1693_s11   ;;  %s1015_s10 = sphi %s1048_s10, %s1692_s10   ;;  %s1011_s9 = sphi %s1046_s9, %s1691_s9  }
   0x8   : > { %s1071_s15 = sadd.s32 1, %s1023_s12   ;;  %s28_s16 = sadd.s32 1, %s1019_s11 }
   0x9   : > { %s25_s17 = ssub.s32 %s1023_s12, %s1071_s15  ;;  %p35_p0 = scmp.ne.s32.totalorder %s1019_s11, %s1015_s10 }
   0xa   : > { %p26_p1 = scmp.eq.s32.totalorder %s25_s17, 0  ;;  %p36_p2 = scmp.eq.s32.totalorder %s1023_s12, 0 }
   0xb   : > { %p41_p3 = scmp.ne.s32.totalorder %s1015_s10, %s1011_s9  ;;  %p42_p4 = scmp.eq.s32.totalorder %s1067_s13, 0 }
   0xc   : > { %s1083_s18 = scalar_select %p26_p1, %s1019_s11, %s28_s16  }
   0xd   : > { %p1085_p5 = por %p36_p2, %p35_p0  ;;  %p1089_p6 = por %p42_p4, %p41_p3 }
   0xe   : > { %p91_p7 = scmp.eq.s32.totalorder %s1067_s13, 3  ;;  %p97_p8 = scmp.eq.s32.totalorder %s801_s14, 3 }
   0xf   : > { %p845_p9 = scmp.lt.s32.totalorder %s1023_s12, 4  ;;  %s1104_s23 = sand.u32 1, %s1019_s11  }
  0x10   : > { %p1095_p10 = por %p91_p7, %p35_p0  ;;  %p1099_p11 = por %p97_p8, %p41_p3 }
  0x11   : > { %s823_s24 = sshll.u32 %s1023_s12, 5  ;;  %s804_s25 = sshll.u32 %s1104_s23, 5 }
  0x12   : > { %s127_s28 = scalar_lea.hbm %s1682_s0, %s823_s24  ;;  %s121_s30 = scalar_lea.vmem [#allocation2], %s804_s25 }
  0x13   : > { %s128_s29 = sshll.u32 %s127_s28, 4  ;;  %s130_s3 = sshll.u32 %s121_s30, 4  ;;  %s129_s29 = int_to_ptr.hbm [resolvable:$true] %s128_s29  ;;  %s131_s3 = int_to_ptr.vmem [resolvable:$true] %s130_s3 }
  0x14   : > { %p1117_p12 = pnand %p845_p9, %p1085_p5  ;;  %p812_p13 = scmp.ge.s32.totalorder %s1023_s12, 1 }
  0x15   : > { %p161_p0 = scmp.lt.s32.totalorder %s1023_s12, 5  ;;  %s118_s5 = scalar_lea.sflag [#allocation3], %s1104_s23 }
  0x16   : > { %s893_s6 = sshra.s32 %s129_s29, 4  ;;  %p897_p2 = pneg %p1117_p12  ;;  %s894_s6 = int_to_ptr.hbm [resolvable:$true] %s893_s6 }
  0x17   : > { %s895_s7 = scalar_lea.hbm %s894_s6, 32  ;;  %s900_s16 = scalar_lea.hbm %s1682_s0, 128 }
  0x18   : > { %p896_p1 = scmp.ne.s32.totalorder %s894_s6, %s895_s7  ;;  %p901_p5 = scmp.lt.s32.totalorder %s894_s6, %s1682_s0 }
  0x19   : > { %p902_p7 = scmp.lt.s32.totalorder %s900_s16, %s895_s7 }
  0x1a   : > { %p898_p3 = pnand %p897_p2, %p896_p1 }
  0x1b   : > { %p903_p8 = por %p902_p7, %p901_p5 }
  0x1c   : > { %p899_p4 = pneg %p898_p3 }
  0x1e   : > { %p904_p9 = pnand %p903_p8, %p899_p4 }
  0x20   : > { %907 = shalt.err (!%p904_p9)
}
  0x21   : > { %s1025_s26 = smov 128   ;;  %s1026_s27 = smov 8  }
  0x22   : > { %837 = dma.hbm_to_vmem [thread:$0]  (!%p1117_p12), %s129_s29, 512, %s131_s3, %s118_s5, %s1025_s26, %s1025_s26, %s1026_s27  }
  0x23   : > { %p1141_p1 = pnand %p812_p13, %p161_p0  ;;  %s150_s7 = scalar_lea.hbm %s1683_s1, %s823_s24 }
  0x24   : > { %s151_s8 = sshll.u32 %s150_s7, 4  ;;  %s144_s14 = scalar_lea.vmem [#allocation5], %s804_s25  ;;  %s152_s8 = int_to_ptr.hbm [resolvable:$true] %s151_s8 }
  0x25   : > { %s153_s16 = sshll.u32 %s144_s14, 4  ;;  %s141_s17 = scalar_lea.sflag [#allocation6], %s1104_s23  ;;  %s154_s16 = int_to_ptr.vmem [resolvable:$true] %s153_s16 }
  0x26   : > { %s923_s19 = sshra.s32 %s152_s8, 4  ;;  %s930_s30 = scalar_lea.hbm %s1683_s1, 128  ;;  %s924_s19 = int_to_ptr.hbm [resolvable:$true] %s923_s19 }
  0x27   : > { %s925_s29 = scalar_lea.hbm %s924_s19, 32  ;;  %p931_p4 = scmp.lt.s32.totalorder %s924_s19, %s1683_s1 }
  0x28   : > { %p926_p3 = scmp.ne.s32.totalorder %s924_s19, %s925_s29  ;;  %p932_p5 = scmp.lt.s32.totalorder %s930_s30, %s925_s29 }
  0x2a   : > { %p928_p13 = pnand %p926_p3, %p897_p2  ;;  %p933_p7 = por %p932_p5, %p931_p4 }
  0x2c   : > { %p929_p0 = pneg %p928_p13 }
  0x2e   : > { %p934_p8 = pnand %p933_p7, %p929_p0 }
  0x30   : > { %937 = shalt.err (!%p934_p8)
}
  0x31   : > { %840 = dma.hbm_to_vmem [thread:$0]  (!%p1117_p12), %s152_s8, 512, %s154_s16, %s141_s17, %s1025_s26, %s1025_s26, %s1026_s27  }
  0x32   : > { %165 = sbr.rel (%p1141_p1) target bundleno = 315 (0x13b), region = 28  ;;  %s1167_s23 = sand.u32 (!%p1141_p1), 1, %s1015_s10  }
  0x33   : > { %s1170_s25 = sshll.u32 (!%p1141_p1), %s1167_s23, 5  ;;  %s168_s7 = scalar_lea.sflag (!%p1141_p1), [#allocation3], %s1167_s23 }
  0x34   : > { %s171_s14 = scalar_lea.vmem (!%p1141_p1), [#allocation2], %s1170_s25 }
  0x37   : > { %998 = dma.done.wait (%p1089_p6), %s168_s7, 512  }
  0x38   : > { %1000 = vsyncadd (%p1089_p6), %s168_s7, 4294966784  ;;  %s178_s4 = scalar_lea.sflag [#allocation6], %s1167_s23  ;;  %s181_s26 = scalar_lea.vmem [#allocation5], %s1170_s25 }
  0x39   : > { %1002 = dma.done.wait (%p1089_p6), %s178_s4, 512  }
  0x3a   : > { %1004 = vsyncadd (%p1089_p6), %s178_s4, 4294966784  ;;  %v1184_v0 = vld [vmem:[%s171_s14 + $0x10] sm:$0xff]  ;;  %v1186_v1 = vld [vmem:[%s171_s14] sm:$0xff]  ;;  %s1027_s27 = smov 1   ;;  %s1028_s28 = smov 127   ;;  %v219_v22 = vlaneseq }
  0x3b   : > { %234 = vrot.lane.b32.xlu1 %v1184_v0, %s1027_s27  ;;  %230 = vrot.lane.b32.xlu0 %v1186_v1, %s1027_s27  ;;  %v1194_v2 = vld [vmem:[%s171_s14 + $0x18] sm:$0xff]  ;;  %v1196_v3 = vld [vmem:[%s171_s14 + $0x8] sm:$0xff]  ;;  %v1232_v8 = vmul.f32 %v1186_v1, %v1186_v1  ;;  %v1246_v10 = vmul.f32 %v1184_v0, %v1184_v0  ;;  %s827_s20 = sshll.u32 %s1067_s13, 5  ;;  %s207_s8 = scalar_lea.vmem [#allocation7], %s1170_s25 }
  0x3c   : > { %238 = vrot.lane.b32.xlu2 %v1186_v1, %s1028_s28  ;;  %v1208_v4 = vld [vmem:[%s181_s26] sm:$0xff]  ;;  %v1212_v5 = vld [vmem:[%s181_s26 + $0x10] sm:$0xff]  ;;  %v1214_v6 = vld [vmem:[%s181_s26 + $0x8] sm:$0xff]  ;;  %v1236_v9 = vmul.f32 %v1196_v3, %v1196_v3  ;;  %v1250_v11 = vmul.f32 %v1194_v2, %v1194_v2  ;;  %v1328_v23 = vand.u32 127, %v219_v22  ;;  %v1339_v31 = vshrl.u32 %v219_v22, 7  ;;  %s701_s19 = scalar_lea.hbm %s1684_s2, %s827_s20  ;;  %s702_s29 = sshll.u32 %s207_s8, 4  ;;  %s703_s29 = int_to_ptr.vmem [resolvable:$true] %s702_s29 }
  0x3d   : > { %v1220_v7 = vld [vmem:[%s181_s26 + $0x18] sm:$0xff]  ;;  %v1266_v12 = vmul.f32 %v1208_v4, %v1208_v4  ;;  %v1270_v13 = vmul.f32 %v1214_v6, %v1214_v6  ;;  %v1274_v14 = vmul.f32 %v1212_v5, %v1212_v5  ;;  %v1294_v16 = vmul.f32 %v1208_v4, %v1186_v1  ;;  %s704_s3 = sshll.u32 %s701_s19, 4  ;;  %s689_s13 = scalar_lea.sflag [#allocation4], %s1167_s23  ;;  %s705_s3 = int_to_ptr.hbm [resolvable:$true] %s704_s3 }
  0x3e   : > { %v1284_v15 = vmul.f32 %v1220_v7, %v1220_v7  ;;  %v1304_v17 = vmul.f32 %v1214_v6, %v1196_v3  ;;  %v1308_v18 = vmul.f32 %v1212_v5, %v1184_v0  ;;  %v1312_v19 = vmul.f32 %v1220_v7, %v1194_v2  ;;  %s967_s5 = sshra.s32 %s705_s3, 4  ;;  %s973_s25 = scalar_lea.hbm %s1684_s2, 128  ;;  %s968_s5 = int_to_ptr.hbm [resolvable:$true] %s967_s5 }
  0x3f   : > { %vm224_vm0 = vcmp.eq.s32.totalorder %v1328_v23, 0  ;;  %vm225_vm1 = vcmp.eq.s32.totalorder %v1328_v23, 127  ;;  %v1344_v35 = vadd.s32 8, %v1339_v31  ;;  %vm226_vm2 = vcmp.eq.s32.totalorder %v1339_v31, 0  ;;  %s969_s30 = scalar_lea.hbm %s968_s5, 32  ;;  %p974_p9 = scmp.lt.s32.totalorder %s968_s5, %s1684_s2 }
  0x40   : > { %vm266_vm4 = vcmp.lt.s32.totalorder %v1339_v31, 1  ;;  %vm275_vm5 = vcmp.lt.s32.totalorder %v1339_v31, 7  ;;  %p970_p6 = scmp.ne.s32.totalorder %s968_s5, %s969_s30  ;;  %p975_p1 = scmp.lt.s32.totalorder %s973_s25, %s969_s30 }
  0x41   : > { %vm229_vm3 = vcmp.eq.s32.totalorder %v1344_v35, 15 }
  0x42   : > { %p971_p12 = pnand %p970_p6, %p1095_p10  ;;  %p976_p3 = por %p975_p1, %p974_p9 }
  0x43   : > { %236 = vrot.lane.b32.xlu1 %v1194_v2, %s1027_s27  ;;  %232 = vrot.lane.b32.xlu0 %v1196_v3, %s1027_s27 }
  0x44   : > { %240 = vrot.lane.b32.xlu2 %v1196_v3, %s1028_s28  ;;  %p972_p2 = pneg %p971_p12 }
  0x46   : > { %p977_p13 = pnand %p976_p3, %p972_p2 }
  0x4b   : > { %244 = vrot.lane.b32.xlu1 %v1194_v2, %s1028_s28  ;;  %242 = vrot.lane.b32.xlu0 %v1184_v0, %s1028_s28 }
  0x4c   : > { %300 = vrot.lane.b32.xlu2 %v1208_v4, %s1027_s27 }
  0x53   : > { %304 = vrot.lane.b32.xlu1 %v1212_v5, %s1027_s27  ;;  %302 = vrot.lane.b32.xlu0 %v1214_v6, %s1027_s27 }
  0x54   : > { %306 = vrot.lane.b32.xlu2 %v1220_v7, %s1027_s27 }
  0x5b   : > { %310 = vrot.lane.b32.xlu1 %v1214_v6, %s1028_s28  ;;  %308 = vrot.lane.b32.xlu0 %v1208_v4, %s1028_s28 }
  0x5c   : > { %312 = vrot.lane.b32.xlu2 %v1212_v5, %s1028_s28 }
  0x63   : > { %314 = vrot.lane.b32.xlu0 %v1220_v7, %s1028_s28  ;;  %372 = vrot.lane.b32.xlu1 %v1232_v8, %s1027_s27 }
  0x64   : > { %374 = vrot.lane.b32.xlu2 %v1236_v9, %s1027_s27 }
  0x6b   : > { %376 = vrot.lane.b32.xlu0 %v1246_v10, %s1027_s27  ;;  %378 = vrot.lane.b32.xlu1 %v1250_v11, %s1027_s27 }
  0x6c   : > { %380 = vrot.lane.b32.xlu2 %v1232_v8, %s1028_s28 }
  0x73   : > { %382 = vrot.lane.b32.xlu0 %v1236_v9, %s1028_s28  ;;  %384 = vrot.lane.b32.xlu1 %v1246_v10, %s1028_s28 }
  0x74   : > { %386 = vrot.lane.b32.xlu2 %v1250_v11, %s1028_s28 }
  0x7b   : > { %444 = vrot.lane.b32.xlu0 %v1266_v12, %s1027_s27  ;;  %446 = vrot.lane.b32.xlu1 %v1270_v13, %s1027_s27 }
  0x7c   : > { %448 = vrot.lane.b32.xlu2 %v1274_v14, %s1027_s27 }
  0x83   : > { %450 = vrot.lane.b32.xlu0 %v1284_v15, %s1027_s27  ;;  %452 = vrot.lane.b32.xlu1 %v1266_v12, %s1028_s28 }
  0x84   : > { %454 = vrot.lane.b32.xlu2 %v1270_v13, %s1028_s28 }
  0x8b   : > { %456 = vrot.lane.b32.xlu0 %v1274_v14, %s1028_s28  ;;  %458 = vrot.lane.b32.xlu1 %v1284_v15, %s1028_s28 }
  0x8c   : > { %516 = vrot.lane.b32.xlu2 %v1294_v16, %s1027_s27 }
  0x93   : > { %518 = vrot.lane.b32.xlu0 %v1304_v17, %s1027_s27  ;;  %520 = vrot.lane.b32.xlu1 %v1308_v18, %s1027_s27 }
  0x94   : > { %522 = vrot.lane.b32.xlu2 %v1312_v19, %s1027_s27 }
  0x96   : > { %v239_v20 = vpop.permute.xlu2 %238 }
  0x9b   : > { %524 = vrot.lane.b32.xlu0 %v1294_v16, %s1028_s28  ;;  %526 = vrot.lane.b32.xlu1 %v1304_v17, %s1028_s28 }
  0x9c   : > { %528 = vrot.lane.b32.xlu2 %v1308_v18, %s1028_s28 }
  0x9e   : > { %v241_v21 = vpop.permute.xlu2 %240 }
  0xa3   : > { %530 = vrot.lane.b32.xlu0 %v1312_v19, %s1028_s28 }
  0xa6   : > { %v1330_v24 = vpop.permute.xlu2 %300 }
  0xad   : > { %v235_v25 = vpop.permute.xlu1 %234  ;;  %v231_v26 = vpop.permute.xlu0 %230 }
  0xae   : > { %v246_v27 = vsel %vm224_vm0, %v239_v20, %v231_v26  ;;  %v254_v28 = vsel %vm225_vm1, %v231_v26, %v239_v20  ;;  %v1341_v32 = vpop.permute.xlu2 %306 }
  0xaf   : > { %v250_v29 = vadd.f32 %v246_v27, %v1186_v1 }
  0xb1   : > { %v258_v30 = vadd.f32 %v254_v28, %v250_v29 }
  0xb3   : > { %v262_v40 = vrot.slane %v258_v30, 7  ;;  %v271_v41 = vrot.slane %v258_v30, 1 }
  0xb5   : > { %v237_v33 = vpop.permute.xlu1 %236  ;;  %v233_v34 = vpop.permute.xlu0 %232 }
  0xb6   : > { %v247_v36 = vsel %vm224_vm0, %v241_v21, %v233_v34  ;;  %v255_v37 = vsel %vm225_vm1, %v233_v34, %v241_v21  ;;  %v313_v44 = vpop.permute.xlu2 %312 }
  0xb7   : > { %v251_v38 = vadd.f32 %v247_v36, %v1196_v3 }
  0xb9   : > { %v259_v39 = vadd.f32 %v255_v37, %v251_v38 }
  0xbb   : > { %v264_v42 = vrot.slane %v259_v39, 7  ;;  %v273_v43 = vrot.slane %v259_v39, 1 }
  0xbd   : > { %v267_v45 = vsel %vm266_vm4, %v262_v40, %v264_v42  ;;  %v269_v46 = vsel %vm266_vm4, %v264_v42, %v262_v40  ;;  %v276_v47 = vsel %vm275_vm5, %v271_v41, %v273_v43  ;;  %v278_v48 = vsel %vm275_vm5, %v273_v43, %v271_v41  ;;  %v245_v49 = vpop.permute.xlu1 %244  ;;  %v243_v50 = vpop.permute.xlu0 %242 }
  0xbe   : > { %v280_v51 = vsel %vm226_vm2, %v276_v47, %v269_v46  ;;  %v285_v52 = vadd.f32 %v267_v45, %v259_v39  ;;  %v289_v53 = vsel %vm229_vm3, %v267_v45, %v278_v48  ;;  %v249_v54 = vsel %vm224_vm0, %v245_v49, %v237_v33  ;;  %v1389_v29 = vpop.permute.xlu2 %374 }
  0xbf   : > { %v284_v55 = vadd.f32 %v280_v51, %v258_v30  ;;  %v253_v56 = vadd.f32 %v249_v54, %v1194_v2  ;;  %v257_v57 = vsel %vm225_vm1, %v237_v33, %v245_v49  ;;  %v248_v58 = vsel %vm224_vm0, %v243_v50, %v235_v25 }
  0xc0   : > { %v1374_v59 = vadd.f32 %v289_v53, %v285_v52  ;;  %v252_v60 = vadd.f32 %v248_v58, %v1184_v0  ;;  %v256_v61 = vsel %vm225_vm1, %v235_v25, %v243_v50 }
  0xc1   : > { %v1379_v62 = vadd.f32 %v284_v55, %v276_v47  ;;  %v261_v63 = vadd.f32 %v257_v57, %v253_v56 }
  0xc2   : > { %v260_v1 = vadd.f32 %v256_v61, %v252_v60 }
  0xc3   : > { %v265_v3 = vrot.slane %v261_v63, 7  ;;  %v274_v20 = vrot.slane %v261_v63, 1 }
  0xc4   : > { %v263_v2 = vrot.slane %v260_v1, 7  ;;  %v272_v21 = vrot.slane %v260_v1, 1 }
  0xc5   : > { %v305_v22 = vpop.permute.xlu1 %304  ;;  %v303_v26 = vpop.permute.xlu0 %302 }
  0xc6   : > { %v268_v27 = vsel %vm266_vm4, %v263_v2, %v265_v3  ;;  %v270_v28 = vsel %vm266_vm4, %v265_v3, %v263_v2  ;;  %v277_v0 = vsel %vm275_vm5, %v272_v21, %v274_v20  ;;  %v279_v25 = vsel %vm275_vm5, %v274_v20, %v272_v21  ;;  %v381_v42 = vpop.permute.xlu2 %380 }
  0xc7   : > { %v282_v30 = vsel %vm226_vm2, %v277_v0, %v270_v28  ;;  %v287_v33 = vadd.f32 %v268_v27, %v261_v63  ;;  %v291_v34 = vsel %vm229_vm3, %v268_v27, %v279_v25  ;;  %v318_v41 = vsel %vm224_vm0, %v313_v44, %v305_v22 }
  0xc8   : > { %v286_v36 = vadd.f32 %v282_v30, %v260_v1  ;;  %v322_v43 = vadd.f32 %v318_v41, %v1212_v5  ;;  %v326_v45 = vsel %vm225_vm1, %v305_v22, %v313_v44 }
  0xc9   : > { %v295_v37 = vadd.f32 %v291_v34, %v287_v33 }
  0xca   : > { %v294_v38 = vadd.f32 %v286_v36, %v277_v0  ;;  %v330_v49 = vadd.f32 %v326_v45, %v322_v43 }
  0xcb   : > { %v299_v22 = vmul.f32 0.11111111, %v295_v37 }
  0xcc   : > { %v333_v44 = vrot.slane %v330_v49, 7  ;;  %v341_v56 = vrot.slane %v330_v49, 1  ;;  %v298_v0 = vmul.f32 0.11111111, %v294_v38 }
  0xcd   : > { %v311_v39 = vpop.permute.xlu1 %310  ;;  %v309_v40 = vpop.permute.xlu0 %308  ;;  %v1433_v36 = vmul.f32 %v299_v22, %v299_v22 }
  0xce   : > { %v317_v5 = vsel %vm224_vm0, %v311_v39, %v303_v26  ;;  %v1409_v53 = vpop.permute.xlu2 %386  ;;  %v316_v57 = vsel %vm224_vm0, %v309_v40, %v1330_v24  ;;  %v325_v21 = vsel %vm225_vm1, %v303_v26, %v311_v39  ;;  %v324_v30 = vsel %vm225_vm1, %v1330_v24, %v309_v40 }
  0xcf   : > { %v320_v20 = vadd.f32 %v316_v57, %v1208_v4  ;;  %v1441_v37 = vmul.f32 %v298_v0, %v298_v0 }
  0xd1   : > { %v328_v34 = vadd.f32 %v324_v30, %v320_v20 }
  0xd5   : > { %v315_v46 = vpop.permute.xlu0 %314  ;;  %v373_v47 = vpop.permute.xlu1 %372 }
  0xd6   : > { %v319_v48 = vsel %vm224_vm0, %v315_v46, %v1341_v32  ;;  %v327_v51 = vsel %vm225_vm1, %v1341_v32, %v315_v46  ;;  %v1439_v26 = vpop.permute.xlu2 %448 }
  0xd7   : > { %v323_v50 = vadd.f32 %v319_v48, %v1220_v7  ;;  %v321_v7 = vadd.f32 %v317_v5, %v1214_v6 }
  0xd9   : > { %v331_v52 = vadd.f32 %v327_v51, %v323_v50  ;;  %v329_v25 = vadd.f32 %v325_v21, %v321_v7  ;;  %v332_v51 = vrot.slane %v328_v34, 7 }
  0xdb   : > { %v335_v54 = vrot.slane %v331_v52, 7  ;;  %v343_v55 = vrot.slane %v331_v52, 1  ;;  %v334_v38 = vrot.slane %v329_v25, 7  ;;  %v342_v50 = vrot.slane %v329_v25, 1 }
  0xdd   : > { %v337_v58 = vsel %vm266_vm4, %v333_v44, %v335_v54  ;;  %v339_v32 = vsel %vm266_vm4, %v335_v54, %v333_v44  ;;  %v377_v60 = vpop.permute.xlu0 %376  ;;  %v379_v61 = vpop.permute.xlu1 %378  ;;  %v345_v63 = vsel %vm275_vm5, %v341_v56, %v343_v55  ;;  %v347_v1 = vsel %vm275_vm5, %v343_v55, %v341_v56 }
  0xde   : > { %v355_v3 = vadd.f32 %v337_v58, %v331_v52  ;;  %v350_v6 = vsel %vm226_vm2, %v345_v63, %v339_v32  ;;  %v359_v2 = vsel %vm229_vm3, %v337_v58, %v347_v1  ;;  %v340_v52 = vrot.slane %v328_v34, 1 }
  0xdf   : > { %v354_v27 = vadd.f32 %v350_v6, %v330_v49  ;;  %v388_v49 = vsel %vm224_vm0, %v381_v42, %v373_v47  ;;  %v396_v56 = vsel %vm225_vm1, %v373_v47, %v381_v42  ;;  %v338_v58 = vsel %vm266_vm4, %v334_v38, %v332_v51  ;;  %v455_v6 = vpop.permute.xlu2 %454 }
  0xe0   : > { %v363_v28 = vadd.f32 %v359_v2, %v355_v3  ;;  %v392_v54 = vadd.f32 %v388_v49, %v1232_v8  ;;  %v344_v32 = vsel %vm275_vm5, %v340_v52, %v342_v50  ;;  %v336_v8 = vsel %vm266_vm4, %v332_v51, %v334_v38 }
  0xe1   : > { %v362_v33 = vadd.f32 %v354_v27, %v345_v63  ;;  %v348_v20 = vsel %vm226_vm2, %v344_v32, %v338_v58  ;;  %v353_v2 = vadd.f32 %v336_v8, %v329_v25 }
  0xe2   : > { %v367_v4 = vmul.f32 0.11111111, %v363_v28  ;;  %v400_v42 = vadd.f32 %v396_v56, %v392_v54 }
  0xe3   : > { %v366_v41 = vmul.f32 0.11111111, %v362_v33 }
  0xe4   : > { %v1435_v43 = vmul.f32 %v367_v4, %v367_v4  ;;  %v1437_v45 = vmul.f32 %v367_v4, %v299_v22  ;;  %v404_v30 = vrot.slane %v400_v42, 7  ;;  %v412_v33 = vrot.slane %v400_v42, 1 }
  0xe5   : > { %v383_v39 = vpop.permute.xlu0 %382  ;;  %v385_v46 = vpop.permute.xlu1 %384  ;;  %v1443_v48 = vmul.f32 %v366_v41, %v366_v41  ;;  %v1445_v24 = vmul.f32 %v366_v41, %v298_v0  ;;  %v399_v0 = vsel %vm225_vm1, %v379_v61, %v1409_v53  ;;  %v352_v41 = vadd.f32 %v348_v20, %v328_v34 }
  0xe6   : > { %v1449_v40 = vadd.f32 %v1435_v43, %v1433_v36  ;;  %v389_v5 = vsel %vm224_vm0, %v383_v39, %v1389_v29  ;;  %v397_v57 = vsel %vm225_vm1, %v1389_v29, %v383_v39  ;;  %v390_v7 = vsel %vm224_vm0, %v385_v46, %v377_v60 }
  0xe7   : > { %v1458_v44 = vadd.f32 %v1443_v48, %v1441_v37  ;;  %v393_v55 = vadd.f32 %v389_v5, %v1236_v9  ;;  %v391_v9 = vsel %vm224_vm0, %v1409_v53, %v379_v61  ;;  %v346_v29 = vsel %vm275_vm5, %v342_v50, %v340_v52 }
  0xe8   : > { %v394_v47 = vadd.f32 %v390_v7, %v1246_v10  ;;  %v395_v21 = vadd.f32 %v391_v9, %v1250_v11  ;;  %v357_v28 = vsel %vm229_vm3, %v336_v8, %v346_v29  ;;  %v398_v10 = vsel %vm225_vm1, %v377_v60, %v385_v46 }
  0xe9   : > { %v401_v63 = vadd.f32 %v397_v57, %v393_v55  ;;  %v361_v11 = vadd.f32 %v357_v28, %v353_v2  ;;  %v1505_v52 = vmul.f32 0.11111111, %v1374_v59  ;;  %v1517_v29 = vmul.f32 0.11111111, %v1379_v62  ;;  %v1529_v2 = vpop.permute.xlu2 %516 }
  0xea   : > { %v402_v4 = vadd.f32 %v398_v10, %v394_v47  ;;  %v403_v38 = vadd.f32 %v399_v0, %v395_v21 }
  0xeb   : > { %v406_v22 = vrot.slane %v401_v63, 7  ;;  %v414_v27 = vrot.slane %v401_v63, 1  ;;  %v1511_v56 = vmul.f32 0.11111111, %v361_v11  ;;  %v585_v62 = vmul.f32 %v1505_v52, %v1505_v52 }
  0xec   : > { %v405_v46 = vrot.slane %v402_v4, 7  ;;  %v413_v54 = vrot.slane %v402_v4, 1  ;;  %v407_v57 = vrot.slane %v403_v38, 7  ;;  %v415_v58 = vrot.slane %v403_v38, 1 }
  0xed   : > { %v445_v1 = vpop.permute.xlu0 %444  ;;  %v447_v3 = vpop.permute.xlu1 %446  ;;  %v410_v39 = vsel %vm266_vm4, %v406_v22, %v404_v30  ;;  %v416_v49 = vsel %vm275_vm5, %v412_v33, %v414_v27  ;;  %v408_v53 = vsel %vm266_vm4, %v404_v30, %v406_v22  ;;  %v418_v61 = vsel %vm275_vm5, %v414_v27, %v412_v33 }
  0xee   : > { %v461_v25 = vsel %vm224_vm0, %v455_v6, %v447_v3  ;;  %v469_v34 = vsel %vm225_vm1, %v447_v3, %v455_v6  ;;  %v420_v5 = vsel %vm226_vm2, %v416_v49, %v410_v39  ;;  %v425_v7 = vadd.f32 %v408_v53, %v401_v63 }
  0xef   : > { %v465_v60 = vadd.f32 %v461_v25, %v1270_v13  ;;  %v360_v13 = vadd.f32 %v352_v41, %v344_v32  ;;  %v429_v8 = vsel %vm229_vm3, %v408_v53, %v418_v61  ;;  %v424_v47 = vadd.f32 %v420_v5, %v400_v42 }
  0xf0   : > { %v409_v3 = vsel %vm266_vm4, %v405_v46, %v407_v57  ;;  %v411_v63 = vsel %vm266_vm4, %v407_v57, %v405_v46  ;;  %v417_v20 = vsel %vm275_vm5, %v413_v54, %v415_v58  ;;  %v419_v6 = vsel %vm275_vm5, %v415_v58, %v413_v54 }
  0xf1   : > { %v473_v9 = vadd.f32 %v469_v34, %v465_v60  ;;  %v1533_v42 = vmul.f32 0.11111111, %v360_v13  ;;  %v433_v21 = vadd.f32 %v429_v8, %v425_v7  ;;  %v432_v10 = vadd.f32 %v424_v47, %v416_v49 }
  0xf2   : > { %v422_v30 = vsel %vm226_vm2, %v417_v20, %v411_v63  ;;  %v427_v33 = vadd.f32 %v409_v3, %v403_v38  ;;  %v431_v25 = vsel %vm229_vm3, %v409_v3, %v419_v6 }
  0xf3   : > { %v478_v22 = vrot.slane %v473_v9, 7  ;;  %v486_v27 = vrot.slane %v473_v9, 1  ;;  %v437_v13 = vmul.f32 0.11111111, %v433_v21  ;;  %v436_v8 = vmul.f32 0.11111111, %v432_v10  ;;  %v1569_v21 = vpop.permute.xlu2 %522 }
  0xf4   : > { %v588_v47 = vmul.f32 %v1533_v42, %v1533_v42  ;;  %v435_v63 = vadd.f32 %v431_v25, %v427_v33 }
  0xf5   : > { %v451_v50 = vpop.permute.xlu0 %450  ;;  %v453_v51 = vpop.permute.xlu1 %452 }
  0xf6   : > { %v460_v55 = vsel %vm224_vm0, %v453_v51, %v445_v1  ;;  %v468_v32 = vsel %vm225_vm1, %v445_v1, %v453_v51  ;;  %v589_v1 = vmul.f32 %v1511_v56, %v1511_v56  ;;  %v426_v51 = vadd.f32 %v422_v30, %v402_v4 }
  0xf7   : > { %v464_v59 = vadd.f32 %v460_v55, %v1266_v12 }
  0xf8   : > { %v629_v10 = vadd.f32 %v589_v1, %v585_v62 }
  0xf9   : > { %v472_v12 = vadd.f32 %v468_v32, %v464_v59 }
  0xfb   : > { %v476_v28 = vrot.slane %v472_v12, 7  ;;  %v484_v0 = vrot.slane %v472_v12, 1 }
  0xfd   : > { %v457_v41 = vpop.permute.xlu0 %456  ;;  %v459_v11 = vpop.permute.xlu1 %458  ;;  %v480_v39 = vsel %vm266_vm4, %v476_v28, %v478_v22  ;;  %v482_v53 = vsel %vm266_vm4, %v478_v22, %v476_v28  ;;  %v488_v60 = vsel %vm275_vm5, %v484_v0, %v486_v27  ;;  %v490_v49 = vsel %vm275_vm5, %v486_v27, %v484_v0 }
  0xfe   : > { %v492_v38 = vsel %vm226_vm2, %v488_v60, %v482_v53  ;;  %v497_v61 = vadd.f32 %v480_v39, %v473_v9  ;;  %v501_v46 = vsel %vm229_vm3, %v480_v39, %v490_v49  ;;  %v462_v34 = vsel %vm224_vm0, %v457_v41, %v1439_v26 }
  0xff   : > { %v496_v5 = vadd.f32 %v492_v38, %v472_v12  ;;  %v466_v54 = vadd.f32 %v462_v34, %v1274_v14  ;;  %v463_v55 = vsel %vm224_vm0, %v459_v11, %v451_v50  ;;  %v470_v7 = vsel %vm225_vm1, %v1439_v26, %v457_v41 }
 0x100   : > { %v505_v57 = vadd.f32 %v501_v46, %v497_v61  ;;  %v467_v58 = vadd.f32 %v463_v55, %v1284_v15  ;;  %v471_v4 = vsel %vm225_vm1, %v451_v50, %v459_v11  ;;  %v584_v14 = vmul.f32 %v1517_v29, %v1517_v29 }
 0x101   : > { %v504_v9 = vadd.f32 %v496_v5, %v488_v60  ;;  %v474_v59 = vadd.f32 %v470_v7, %v466_v54  ;;  %v597_v15 = vsub.f32 %v437_v13, %v585_v62  ;;  %v434_v41 = vadd.f32 %v426_v51, %v417_v20 }
 0x102   : > { %v509_v3 = vmul.f32 0.11111111, %v505_v57  ;;  %v475_v32 = vadd.f32 %v471_v4, %v467_v58  ;;  %v596_v30 = vsub.f32 %v436_v8, %v584_v14  ;;  %v628_v20 = vadd.f32 %v588_v47, %v584_v14 }
 0x103   : > { %v508_v6 = vmul.f32 0.11111111, %v504_v9  ;;  %v477_v12 = vrot.slane %v474_v59, 7  ;;  %v485_v26 = vrot.slane %v474_v59, 1  ;;  %v439_v38 = vmul.f32 0.11111111, %v435_v63 }
 0x104   : > { %v601_v22 = vsub.f32 %v509_v3, %v589_v1  ;;  %v479_v27 = vrot.slane %v475_v32, 7  ;;  %v487_v28 = vrot.slane %v475_v32, 1  ;;  %v438_v34 = vmul.f32 0.11111111, %v434_v41 }
 0x105   : > { %v519_v0 = vpop.permute.xlu0 %518  ;;  %v521_v50 = vpop.permute.xlu1 %520  ;;  %v600_v11 = vsub.f32 %v508_v6, %v588_v47  ;;  %v633_v13 = vadd.f32 0.0001, %v629_v10  ;;  %v632_v7 = vadd.f32 0.0001, %v628_v20  ;;  %v599_v58 = vsub.f32 %v439_v38, %v1433_v36 }
 0x106   : > { %v637_v39 = vadd.f32 %v601_v22, %v597_v15  ;;  %v481_v53 = vsel %vm266_vm4, %v477_v12, %v479_v27  ;;  %v483_v33 = vsel %vm266_vm4, %v479_v27, %v477_v12  ;;  %v489_v25 = vsel %vm275_vm5, %v485_v26, %v487_v28  ;;  %v529_v6 = vpop.permute.xlu2 %528 }
 0x107   : > { %v636_v60 = vadd.f32 %v600_v11, %v596_v30  ;;  %v491_v49 = vsel %vm275_vm5, %v487_v28, %v485_v26  ;;  %v494_v62 = vsel %vm226_vm2, %v489_v25, %v483_v33  ;;  %v499_v1 = vadd.f32 %v481_v53, %v475_v32 }
 0x108   : > { %v498_v61 = vadd.f32 %v494_v62, %v474_v59  ;;  %v503_v46 = vsel %vm229_vm3, %v481_v53, %v491_v49  ;;  %v641_v51 = vadd.f32 0.0009, %v637_v39  ;;  %v598_v14 = vsub.f32 %v438_v34, %v1441_v37 }
 0x109   : > { %v507_v5 = vadd.f32 %v503_v46, %v499_v1  ;;  %v640_v54 = vadd.f32 0.0009, %v636_v60  ;;  %v635_v26 = vadd.f32 0.0001, %v1449_v40  ;;  %v634_v22 = vadd.f32 0.0001, %v1458_v44 }
 0x10a   : > { %v506_v55 = vadd.f32 %v498_v61, %v489_v25  ;;  %v645_v47 = vmul.f32 %v641_v51, %v633_v13  ;;  %v534_v10 = vsel %vm224_vm0, %v529_v6, %v521_v50  ;;  %v593_v46 = vmul.f32 %v1511_v56, %v1505_v52 }
 0x10b   : > { %v511_v57 = vmul.f32 0.11111111, %v507_v5  ;;  %v644_v32 = vmul.f32 %v640_v54, %v632_v7  ;;  %v538_v44 = vadd.f32 %v534_v10, %v1308_v18 }
 0x10c   : > { %v510_v8 = vmul.f32 0.11111111, %v506_v55  ;;  %885 = vrcp.f32 %v645_v47  ;;  %v592_v55 = vmul.f32 %v1533_v42, %v1517_v29 }
 0x10d   : > { %v525_v9 = vpop.permute.xlu0 %524  ;;  %v527_v4 = vpop.permute.xlu1 %526  ;;  %v603_v59 = vsub.f32 %v511_v57, %v1435_v43  ;;  %887 = vrcp.f32 %v644_v32 }
 0x10e   : > { %v532_v3 = vsel %vm224_vm0, %v525_v9, %v1529_v2  ;;  %v602_v63 = vsub.f32 %v510_v8, %v1443_v48  ;;  %v533_v36 = vsel %vm224_vm0, %v527_v4, %v519_v0  ;;  %v540_v43 = vsel %vm225_vm1, %v1529_v2, %v525_v9 }
 0x10f   : > { %v536_v12 = vadd.f32 %v532_v3, %v1294_v16  ;;  %v639_v15 = vadd.f32 %v603_v59, %v599_v58  ;;  %v537_v37 = vadd.f32 %v533_v36, %v1304_v17  ;;  %v541_v48 = vsel %vm225_vm1, %v519_v0, %v527_v4 }
 0x110   : > { %v638_v27 = vadd.f32 %v602_v63, %v598_v14  ;;  %v542_v0 = vsel %vm225_vm1, %v521_v50, %v529_v6  ;;  %v609_v9 = vmul.f32 2.0, %v593_v46  ;;  %v608_v3 = vmul.f32 2.0, %v592_v55 }
 0x111   : > { %v544_v28 = vadd.f32 %v540_v43, %v536_v12  ;;  %v643_v16 = vadd.f32 0.0009, %v639_v15  ;;  %v545_v40 = vadd.f32 %v541_v48, %v537_v37  ;;  %v546_v61 = vadd.f32 %v542_v0, %v538_v44 }
 0x112   : > { %v642_v30 = vadd.f32 0.0009, %v638_v27  ;;  %v886_v1 = vpop.eup %885  ;;  %v613_v43 = vadd.f32 0.0001, %v609_v9 }
 0x113   : > { %v548_v41 = vrot.slane %v544_v28, 7  ;;  %v556_v11 = vrot.slane %v544_v28, 1  ;;  %v647_v2 = vmul.f32 %v643_v16, %v635_v26  ;;  %v550_v39 = vrot.slane %v545_v40, 7  ;;  %v888_v38 = vpop.eup %887 }
 0x114   : > { %v558_v17 = vrot.slane %v545_v40, 1  ;;  %v1603_v53 = vmul.f32 %v642_v30, %v634_v22  ;;  %v653_v13 = vmul.f32 %v886_v1, %v645_v47  ;;  %v652_v58 = vmul.f32 %v888_v38, %v644_v32 }
 0x115   : > { %v552_v33 = vsel %vm266_vm4, %v548_v41, %v550_v39  ;;  %v554_v25 = vsel %vm266_vm4, %v550_v39, %v548_v41  ;;  %v531_v60 = vpop.permute.xlu0 %530  ;;  %889 = vrcp.f32 %v647_v2  ;;  %v549_v8 = vrot.slane %v546_v61, 7 }
 0x116   : > { %v560_v49 = vsel %vm275_vm5, %v556_v11, %v558_v17  ;;  %v562_v62 = vsel %vm275_vm5, %v558_v17, %v556_v11  ;;  %v569_v20 = vadd.f32 %v552_v33, %v545_v40  ;;  %v535_v51 = vsel %vm224_vm0, %v531_v60, %v1569_v21 }
 0x117   : > { %v564_v18 = vsel %vm226_vm2, %v560_v49, %v554_v25  ;;  %v573_v50 = vsel %vm229_vm3, %v552_v33, %v562_v62  ;;  %v539_v54 = vadd.f32 %v535_v51, %v1312_v19  ;;  %v543_v7 = vsel %vm225_vm1, %v1569_v21, %v531_v60 }
 0x118   : > { %v568_v34 = vadd.f32 %v564_v18, %v544_v28  ;;  %v577_v5 = vadd.f32 %v573_v50, %v569_v20  ;;  %891 = vrcp.f32 %v1603_v53  ;;  %v557_v29 = vrot.slane %v546_v61, 1 }
 0x119   : > { %v547_v56 = vadd.f32 %v543_v7, %v539_v54  ;;  %v657_v42 = vsub.f32 2.0, %v653_v13  ;;  %v656_v63 = vsub.f32 2.0, %v652_v58  ;;  %v612_v28 = vadd.f32 0.0001, %v608_v3 }
 0x11a   : > { %v576_v57 = vadd.f32 %v568_v34, %v560_v49  ;;  %v581_v52 = vmul.f32 0.11111111, %v577_v5  ;;  %v611_v33 = vmul.f32 2.0, %v1437_v45  ;;  %v610_v62 = vmul.f32 2.0, %v1445_v24 }
 0x11b   : > { %v551_v19 = vrot.slane %v547_v56, 7  ;;  %v559_v59 = vrot.slane %v547_v56, 1  ;;  %v890_v15 = vpop.eup %889  ;;  %v660_v30 = vmul.f32 %v888_v38, %v656_v63  ;;  %v661_v41 = vmul.f32 %v886_v1, %v657_v42 }
 0x11c   : > { %v580_v4 = vmul.f32 0.11111111, %v576_v57  ;;  %v605_v14 = vsub.f32 %v581_v52, %v593_v46  ;;  %v655_v39 = vmul.f32 %v890_v15, %v647_v2  ;;  %v615_v38 = vadd.f32 0.0001, %v611_v33 }
 0x11d   : > { %v553_v23 = vsel %vm266_vm4, %v549_v8, %v551_v19  ;;  %v555_v21 = vsel %vm266_vm4, %v551_v19, %v549_v8  ;;  %v561_v12 = vsel %vm275_vm5, %v557_v29, %v559_v59  ;;  %v563_v36 = vsel %vm275_vm5, %v559_v59, %v557_v29 }
 0x11e   : > { %v604_v47 = vsub.f32 %v580_v4, %v592_v55  ;;  %v617_v6 = vmul.f32 2.0, %v605_v14  ;;  %v571_v26 = vadd.f32 %v553_v23, %v547_v56  ;;  %v566_v22 = vsel %vm226_vm2, %v561_v12, %v555_v21  ;;  %v892_v40 = vpop.eup %891 }
 0x11f   : > { %v575_v27 = vsel %vm229_vm3, %v553_v23, %v563_v36  ;;  %v570_v16 = vadd.f32 %v566_v22, %v546_v61  ;;  %v654_v31 = vmul.f32 %v892_v40, %v1603_v53  ;;  %v659_v20 = vsub.f32 2.0, %v655_v39 }
 0x120   : > { %v616_v32 = vmul.f32 2.0, %v604_v47  ;;  %v621_v37 = vadd.f32 0.0009, %v617_v6  ;;  %v579_v10 = vadd.f32 %v575_v27, %v571_v26  ;;  %v614_v5 = vadd.f32 0.0001, %v610_v62 }
 0x121   : > { %v578_v44 = vadd.f32 %v570_v16, %v561_v12  ;;  %v658_v46 = vsub.f32 2.0, %v654_v31  ;;  %v663_v57 = vmul.f32 %v890_v15, %v659_v20 }
 0x122   : > { %v620_v48 = vadd.f32 0.0009, %v616_v32  ;;  %v625_v11 = vmul.f32 %v621_v37, %v613_v43  ;;  %v583_v0 = vmul.f32 0.11111111, %v579_v10 }
 0x123   : > { %v582_v35 = vmul.f32 0.11111111, %v578_v44  ;;  %v662_v56 = vmul.f32 %v892_v40, %v658_v46 }
 0x124   : > { %v624_v17 = vmul.f32 %v620_v48, %v612_v28  ;;  %v665_v25 = vmul.f32 %v661_v41, %v625_v11  ;;  %v607_v49 = vsub.f32 %v583_v0, %v1437_v45 }
 0x125   : > { %v606_v1 = vsub.f32 %v582_v35, %v1445_v24 }
 0x126   : > { %v664_v60 = vmul.f32 %v660_v30, %v624_v17  ;;  %v669_v18 = vsub.f32 1.0, %v665_v25  ;;  %v619_v2 = vmul.f32 2.0, %v607_v49 }
 0x127   : > { %v618_v51 = vmul.f32 2.0, %v606_v1 }
 0x128   : > { %v668_v50 = vsub.f32 1.0, %v664_v60  ;;  %v673_v61 = vmul.f32 0.5, %v669_v18  ;;  %v623_v53 = vadd.f32 0.0009, %v619_v2 }
 0x129   : > { %v622_v45 = vadd.f32 0.0009, %v618_v51 }
 0x12a   : > { %v672_v34 = vmul.f32 0.5, %v668_v50  ;;  %v677_v54 = vmax.f32 %v673_v61, 0.0  ;;  %v627_v13 = vmul.f32 %v623_v53, %v615_v38 }
 0x12b   : > { %v626_v52 = vmul.f32 %v622_v45, %v614_v5 }
 0x12c   : > { %v676_v55 = vmax.f32 %v672_v34, 0.0  ;;  %v681_v7 = vmin.f32 %v677_v54, 1.0  ;;  %v667_v24 = vmul.f32 %v663_v57, %v627_v13 }
 0x12d   : > { %v666_v8 = vmul.f32 %v662_v56, %v626_v52 }
 0x12e   : > { %v680_v58 = vmin.f32 %v676_v55, 1.0  ;;  %685 = vst [vmem:[%s207_s8 + $0x8] sm:$0xff] %v681_v7  ;;  %v671_v9 = vsub.f32 1.0, %v667_v24 }
 0x12f   : > { %v670_v4 = vsub.f32 1.0, %v666_v8 }
 0x130   : > { %684 = vst [vmem:[%s207_s8] sm:$0xff] %v680_v58  ;;  %v675_v14 = vmul.f32 0.5, %v671_v9 }
 0x131   : > { %v674_v19 = vmul.f32 0.5, %v670_v4 }
 0x132   : > { %v679_v59 = vmax.f32 %v675_v14, 0.0 }
 0x133   : > { %v678_v3 = vmax.f32 %v674_v19, 0.0 }
 0x134   : > { %v683_v29 = vmin.f32 %v679_v59, 1.0 }
 0x135   : > { %v682_v42 = vmin.f32 %v678_v3, 1.0 }
 0x136   : > { %687 = vst [vmem:[%s207_s8 + $0x18] sm:$0xff] %v683_v29 }
 0x137   : > { %686 = vst [vmem:[%s207_s8 + $0x10] sm:$0xff] %v682_v42 }
 0x138   : > { %980 = shalt.err (!%p977_p13)
}
 0x139   : > { %s1029_s23 = smov 128   ;;  %s1030_s4 = smov 8  }
 0x13a   : > { %832 = dma.vmem_to_hbm [thread:$0]  (%p1095_p10), %s703_s29, 512, %s705_s3, %s689_s13, %s1029_s23, %s1029_s23, %s1030_s4  }
 0x13b PF: > { %p846_p0 = scmp.ge.s32.totalorder %s1023_s12, 2  ;;  %s719_s26 = sand.u32 1, %s1011_s9  }
 0x13c   : > { %s720_s27 = scalar_lea.sflag [#allocation4], %s719_s26 }
 0x13d   : > { %p842_p4 = pnand %p846_p0, %p1099_p11 }
 0x13f   : > { %p843_p5 = pneg %p842_p4 }
 0x141   : > { %1006 = dma.done.wait (%p843_p5), %s720_s27, 512  }
 0x142   : > { %1008 = vsyncadd (%p843_p5), %s720_s27, 4294966784  ;;  %p18_p7 = scmp.ge.s32.totalorder %s1071_s15, 6   ;;  %s1691_s9 = smov %s1015_s10 }
 0x143   : > { %s1692_s10 = smov %s1019_s11  ;;  %s1693_s11 = smov %s1083_s18 }
 0x144   : > { %s1694_s12 = smov %s1071_s15  ;;  %20 = sbr.rel (!%p18_p7) target bundleno = 7 (0x7), region = 86 }
 0x149   :  { %726 = vsyncpa [#allocation3], 1 }
 0x14a   :  { %728 = vsyncpa [#allocation3 + $0x1], 1 }
 0x14b   :  { %729 = vsyncpa [#allocation6], 1 }
 0x14c   :  { %731 = vsyncpa [#allocation6 + $0x1], 1 }
 0x14d   :  { %732 = vsyncpa [#allocation4], 1 }
 0x14e   :  { %734 = vsyncpa [#allocation4 + $0x1], 1 }

</bundles_post_ra>
